<compile_context>
chip_gen: v6e
topology: v6e:2x2x1
jax: 0.10.0
libtpu: 0.0.40
codegen_flags: <defaults>
</compile_context>

<pallas_src>
import functools

import jax
import jax.numpy as jnp
from jax.experimental import pallas as pl
from jax.experimental.pallas import tpu as pltpu


_LEAKY_SLOPE = 0.2
_TARGET_STEP_BYTES = 8 << 20   # per-grid-step HBM payload target (amortizes ~0.35us step cost)


def _round_up(x, m):
    return ((x + m - 1) // m) * m


def _vmem_capacity_bytes():
    """Physical per-core VMEM; conservative fallback if the query is unavailable."""
    try:
        cap = int(pltpu.get_tpu_info().vmem_capacity_bytes)
        if cap > 0:
            return cap
    except Exception:
        pass
    return 64 << 20   # smallest of v5e/v6e/v7x (v7x per-TensorCore)


def _choose_tile(HW, C, height, itemsize, vmem_limit, max_tile_hw=None):
    """Pick a lane tile: VMEM-budget + payload-target driven, never degenerates to 128
    because of HW's factorization (ragged remainder is handled in-kernel)."""
    sub = max(32 // itemsize, 8)               # sublane pack (8 f32, 16 bf16, ...)
    c_pad = _round_up(C, sub)
    per_lane_hbm = (height + 1) * C * itemsize          # bytes moved per output lane
    per_lane_vmem = (height + 1) * c_pad * itemsize     # VMEM footprint per lane (per buffer)

    budget = int(vmem_limit * 0.45)                     # double-buffered feature blocks
    vmem_tile = max(budget // (2 * per_lane_vmem), 128)
    payload_tile = max(_TARGET_STEP_BYTES // per_lane_hbm, 128)
    tile = min(vmem_tile, payload_tile)
    if max_tile_hw is not None:
        tile = min(tile, max(int(max_tile_hw), 128))
    tile = max((tile // 128) * 128, 128)

    if HW <= tile:
        # Single full-extent block (always a legal block shape), no masking needed.
        return HW, 1, False
    n_tiles = (HW + tile - 1) // tile
    return tile, n_tiles, (HW % tile != 0)


def _fused_fits(HW, C, height, itemsize, vmem_limit):
    """Conservative estimate of the fused single-pass per-batch working set."""
    sub = max(32 // itemsize, 8)
    c_pad = _round_up(C, sub)
    hw_pad = _round_up(HW, 128)
    blk = c_pad * hw_pad
    pipelined = 2 * (height + 1) * blk * itemsize   # double-buffered inputs + output
    f32_tmp = (height + 2) * blk * 4                # f32 intermediates (U, acc, casts)
    need = pipelined + f32_tmp + (2 << 20)
    return need <= int(vmem_limit * 0.75)


# ---------------------------------------------------------------------------
# Kernels
# ---------------------------------------------------------------------------

def _pool_kernel(height, hw_valid, needs_mask, *refs):
    """Per-(batch, tile) partial channel sums -> (1, 1, C, 1) block."""
    x_refs = refs[:height]            # each (1, C, TILE)
    s_ref = refs[height]              # (1, 1, C, 1) f32

    u = x_refs[0][0].astype(jnp.float32)
    for h in range(1, height):
        u = u + x_refs[h][0].astype(jnp.float32)

    if needs_mask:
        # Ragged last tile: zero the out-of-bounds lanes (select, so garbage /
        # NaN reads from the overrun region cannot contaminate the sum).
        c_dim, tile = u.shape
        col = jax.lax.broadcasted_iota(jnp.int32, (c_dim, tile), 1)
        col = col + pl.program_id(1) * tile
        u = jnp.where(col < hw_valid, u, 0.0)

    s_ref[0, 0] = jnp.sum(u, axis=-1, keepdims=True)     # XLU lane reduce -> (C, 1)


def _apply_kernel(height, *refs):
    """out[b, :, tile] = sum_h x_h[b, :, tile] * A[b, h, :, None]."""
    a_ref = refs[0]                   # (1, height, C, 1) f32 attention
    x_refs = refs[1:1 + height]       # each (1, C, TILE)
    o_ref = refs[1 + height]          # (1, C, TILE)

    # f32 accumulate kept for all generations (v5e has no bf16 VPU).  Garbage in
    # the ragged last tile stays lane-local; its stores are dropped by Pallas.
    acc = x_refs[0][0].astype(jnp.float32) * a_ref[0, 0]
    for h in range(1, height):
        acc = acc + x_refs[h][0].astype(jnp.float32) * a_ref[0, h]
    o_ref[0] = acc.astype(o_ref.dtype)


def _fused_kernel(height, hw_valid, *refs):
    """Single-pass SKFF for one batch row: features are read from HBM once."""
    wdu_ref = refs[0]                 # (C, d)  conv_du weight, transposed, f32
    wfcs_ref = refs[1]                # (height, C, d) f32
    x_refs = refs[2:2 + height]       # each (1, C, HW)
    o_ref = refs[2 + height]          # (1, C, HW)

    # U = sum_h x_h  (f32)
    u = x_refs[0][0].astype(jnp.float32)
    for h in range(1, height):
        u = u + x_refs[h][0].astype(jnp.float32)

    # S = global average pool (lane reduce; Mosaic masks internal lane padding).
    s = jnp.sum(u, axis=-1, keepdims=True) * (1.0 / hw_valid)       # (C, 1)

    # Z = LeakyReLU_0.2(W_du @ S): keep C on sublanes, reduce over sublanes.
    z = jnp.sum(wdu_ref[...] * s, axis=0, keepdims=True)            # (1, d)
    z = jnp.where(z >= 0, z, _LEAKY_SLOPE * z)

    # Per-branch logits + softmax over branches (tiny elementwise / lane reduces).
    logits = [jnp.sum(wfcs_ref[h] * z, axis=-1, keepdims=True) for h in range(height)]
    m = logits[0]
    for h in range(1, height):
        m = jnp.maximum(m, logits[h])
    exps = [jnp.exp(l - m) for l in logits]
    denom = exps[0]
    for h in range(1, height):
        denom = denom + exps[h]
    inv = 1.0 / denom                                                # (C, 1)

    # V = sum_h x_h * A_h  from the already-resident VMEM copies.
    acc = x_refs[0][0].astype(jnp.float32) * (exps[0] * inv)
    for h in range(1, height):
        acc = acc + x_refs[h][0].astype(jnp.float32) * (exps[h] * inv)
    o_ref[0] = acc.astype(o_ref.dtype)


# ---------------------------------------------------------------------------
# Wrapper
# ---------------------------------------------------------------------------

def skff_forward(inp_feats, w_du, w_fcs, *, force_two_phase=False, max_tile_hw=None):
    """inp_feats: list of `height` arrays (B, C, H, W); returns (B, C, H, W).

    w_du:  (d, C)           -- Conv2d(C->d, 1x1, bias=False) weight
    w_fcs: (height, C, d)   -- per-branch Conv2d(d->C, 1x1, bias=False) weights
    """
    height = len(inp_feats)
    B, C, H, W = inp_feats[0].shape
    HW = H * W
    dtype = inp_feats[0].dtype
    itemsize = jnp.dtype(dtype).itemsize
    d = w_du.shape[0]

    # Contiguous reshape only -- no padding, no extra HBM copy.
    xs = [f.reshape(B, C, HW) for f in inp_feats]

    vmem_cap = _vmem_capacity_bytes()
    vmem_limit = int(min(vmem_cap // 2, 64 << 20))   # v5e/v6e: 64 MiB, v7x: 32 MiB

    # ---- Fused single-pass path (h reads + 1 write per element) --------------
    if (not force_two_phase) and _fused_fits(HW, C, height, itemsize, vmem_limit):
        w_du_t = jnp.transpose(w_du).astype(jnp.float32)     # (C, d)
        w_fcs_f = w_fcs.astype(jnp.float32)                  # (height, C, d)
        out = pl.pallas_call(
            functools.partial(_fused_kernel, height, HW),
            out_shape=jax.ShapeDtypeStruct((B, C, HW), dtype),
            grid=(B,),
            in_specs=[pl.BlockSpec((C, d), lambda b: (0, 0)),
                      pl.BlockSpec((height, C, d), lambda b: (0, 0, 0))]
                     + [pl.BlockSpec((1, C, HW), lambda b: (b, 0, 0))] * height,
            out_specs=pl.BlockSpec((1, C, HW), lambda b: (b, 0, 0)),
            compiler_params=pltpu.CompilerParams(
                dimension_semantics=("parallel",),
                vmem_limit_bytes=vmem_limit),
        )(w_du_t, w_fcs_f, *xs)
        return out.reshape(B, C, H, W)

    # ---- Two-phase path (2h reads + 1 write per element) ---------------------
    tile, n_tiles, needs_mask = _choose_tile(HW, C, height, itemsize, vmem_limit,
                                             max_tile_hw)
    x_spec = pl.BlockSpec((1, C, tile), lambda b, t: (b, 0, t))

    # Phase 1: per-tile partial channel sums, fully parallel grid (megacore-friendly).
    partial_sums = pl.pallas_call(
        functools.partial(_pool_kernel, height, HW, needs_mask),
        out_shape=jax.ShapeDtypeStruct((n_tiles, B, C, 1), jnp.float32),
        grid=(B, n_tiles),
        in_specs=[x_spec] * height,
        out_specs=pl.BlockSpec((1, 1, C, 1), lambda b, t: (t, b, 0, 0)),
        compiler_params=pltpu.CompilerParams(
            dimension_semantics=("parallel", "parallel"),
            vmem_limit_bytes=vmem_limit),
    )(*xs)
    pooled = jnp.sum(partial_sums, axis=0)[..., 0]                   # (B, C)

    # Tiny attention math in plain JAX, batched over B (negligible traffic).
    S = pooled * (1.0 / float(HW))                                   # mean
    Z = jnp.einsum("bc,dc->bd", S, w_du.astype(jnp.float32))         # conv_du 1x1
    Z = jnp.where(Z >= 0, Z, _LEAKY_SLOPE * Z)                       # LeakyReLU(0.2)
    logits = jnp.einsum("bd,hcd->bhc", Z, w_fcs.astype(jnp.float32))
    A = jax.nn.softmax(logits, axis=1)[..., None]                    # (B, height, C, 1)

    # Phase 2: bandwidth-bound weighted sum; output written at exact (B, C, HW).
    out = pl.pallas_call(
        functools.partial(_apply_kernel, height),
        out_shape=jax.ShapeDtypeStruct((B, C, HW), dtype),
        grid=(B, n_tiles),
        in_specs=[pl.BlockSpec((1, height, C, 1), lambda b, t: (b, 0, 0, 0))]
                 + [x_spec] * height,
        out_specs=pl.BlockSpec((1, C, tile), lambda b, t: (b, 0, t)),
        compiler_params=pltpu.CompilerParams(
            dimension_semantics=("parallel", "parallel"),
            vmem_limit_bytes=vmem_limit),
    )(A, *xs)

    return out.reshape(B, C, H, W)


def skff_reference(inp_feats, w_du, w_fcs):
    """Pure-JAX reference mirroring the PyTorch forward."""
    x = jnp.stack(inp_feats, axis=1).astype(jnp.float32)   # (B, height, C, H, W)
    U = jnp.sum(x, axis=1)                                  # (B, C, H, W)
    S = jnp.mean(U, axis=(2, 3))                            # (B, C)
    Z = jnp.einsum("dc,bc->bd", w_du, S)                    # (B, d)
    Z = jnp.where(Z >= 0, Z, _LEAKY_SLOPE * Z)
    A = jnp.einsum("hcd,bd->bhc", w_fcs, Z)                 # (B, height, C)
    A = jax.nn.softmax(A, axis=1)
    V = jnp.sum(x * A[:, :, :, None, None], axis=1)         # (B, C, H, W)
    return V


if __name__ == "__main__":
    B, C = 2, 16
    height, reduction = 2, 8
    d = max(int(C / reduction), 4)

    key = jax.random.PRNGKey(0)
    k1, k2, k3, k4, k5, k6 = jax.random.split(key, 6)

    w_du = jax.random.normal(k3, (d, C), dtype=jnp.float32) * 0.2           # Conv2d(C->d, 1x1)
    w_fcs = jax.random.normal(k4, (height, C, d), dtype=jnp.float32) * 0.2  # height x Conv2d(d->C, 1x1)

    # Test 1: fused single-pass path (small working set), 128-aligned spatial.
    H1 = W1 = 16
    f0 = jax.random.normal(k1, (B, C, H1, W1), dtype=jnp.float32)
    f1 = jax.random.normal(k2, (B, C, H1, W1), dtype=jnp.float32)
    out1 = jax.block_until_ready(skff_forward([f0, f1], w_du, w_fcs))
    ref1 = skff_reference([f0, f1], w_du, w_fcs)
    assert out1.shape == (B, C, H1, W1)
    assert jnp.allclose(out1, ref1, atol=1e-4, rtol=1e-4), \
        float(jnp.max(jnp.abs(out1 - ref1)))

    # Test 2: two-phase path with ragged (non-128-multiple) spatial tiles,
    # forcing several tiles so the in-kernel masking / dropped-write path runs.
    H2 = W2 = 18    # HW = 324
    g0 = jax.random.normal(k5, (B, C, H2, W2), dtype=jnp.float32)
    g1 = jax.random.normal(k6, (B, C, H2, W2), dtype=jnp.float32)
    out2 = jax.block_until_ready(
        skff_forward([g0, g1], w_du, w_fcs, force_two_phase=True, max_tile_hw=128))
    ref2 = skff_reference([g0, g1], w_du, w_fcs)
    assert out2.shape == (B, C, H2, W2)
    assert jnp.allclose(out2, ref2, atol=1e-4, rtol=1e-4), \
        float(jnp.max(jnp.abs(out2 - ref2)))

    print("KERNEL_OK")
</pallas_src>

<mosaic_0001>
module attributes {stable_mosaic.version = 11 : i64} {
  func.func @_fused_kernel(%arg0: i32, %arg1: memref<16x4xf32, #tpu.memory_space<vmem>>, %arg2: memref<2x16x4xf32, #tpu.memory_space<vmem>>, %arg3: memref<1x16x256xf32, #tpu.memory_space<vmem>>, %arg4: memref<1x16x256xf32, #tpu.memory_space<vmem>>, %arg5: memref<1x16x256xf32, #tpu.memory_space<vmem>>) attributes {dimension_semantics = [#tpu.dimension_semantics<parallel>], iteration_bounds = array<i64: 2>, scalar_prefetch = 0 : i64, scratch_operands = 0 : i64, tpu.core_type = #tpu.core_type<tc>, window_params = [{pipeline_mode = #tpu.pipeline_mode<synchronous>, transform_indices = @transform_0, window_bounds = array<i64: 16, 4>}, {pipeline_mode = #tpu.pipeline_mode<synchronous>, transform_indices = @transform_1, window_bounds = array<i64: 2, 16, 4>}, {transform_indices = @transform_2, window_bounds = array<i64: 1, 16, 256>}, {transform_indices = @transform_3, window_bounds = array<i64: 1, 16, 256>}, {transform_indices = @transform_4, window_bounds = array<i64: 1, 16, 256>}]} {
    %c0 = arith.constant 0 : index
    %c0_0 = arith.constant 0 : index
    %c0_1 = arith.constant 0 : index
    %0 = vector.load %arg3[%c0, %c0_0, %c0_1] : memref<1x16x256xf32, #tpu.memory_space<vmem>>, vector<1x16x256xf32>
    %1 = vector.shape_cast %0 : vector<1x16x256xf32> to vector<16x256xf32>
    %c0_2 = arith.constant 0 : index
    %c0_3 = arith.constant 0 : index
    %c0_4 = arith.constant 0 : index
    %2 = vector.load %arg4[%c0_2, %c0_3, %c0_4] : memref<1x16x256xf32, #tpu.memory_space<vmem>>, vector<1x16x256xf32>
    %3 = vector.shape_cast %2 : vector<1x16x256xf32> to vector<16x256xf32>
    %4 = arith.addf %1, %3 : vector<16x256xf32>
    %cst = arith.constant dense<0.000000e+00> : vector<16xf32>
    %5 = vector.multi_reduction <add>, %4, %cst [1] : vector<16x256xf32> to vector<16xf32>
    %6 = vector.shape_cast %5 : vector<16xf32> to vector<16x1xf32>
    %cst_5 = arith.constant 3.906250e-03 : f32
    %7 = vector.broadcast %cst_5 : f32 to vector<16x1xf32>
    %8 = arith.mulf %6, %7 : vector<16x1xf32>
    %c0_6 = arith.constant 0 : index
    %c0_7 = arith.constant 0 : index
    %9 = vector.load %arg1[%c0_6, %c0_7] : memref<16x4xf32, #tpu.memory_space<vmem>>, vector<16x4xf32>
    %10 = vector.broadcast %8 : vector<16x1xf32> to vector<16x4xf32>
    %11 = arith.mulf %9, %10 : vector<16x4xf32>
    %cst_8 = arith.constant dense<0.000000e+00> : vector<4xf32>
    %12 = vector.multi_reduction <add>, %11, %cst_8 [0] : vector<16x4xf32> to vector<4xf32>
    %13 = vector.shape_cast %12 : vector<4xf32> to vector<1x4xf32>
    %cst_9 = arith.constant 0.000000e+00 : f32
    %14 = vector.broadcast %cst_9 : f32 to vector<1x4xf32>
    %15 = arith.cmpf oge, %13, %14 : vector<1x4xf32>
    %cst_10 = arith.constant 2.000000e-01 : f32
    %16 = vector.broadcast %cst_10 : f32 to vector<1x4xf32>
    %17 = arith.mulf %16, %13 : vector<1x4xf32>
    %18 = arith.select %15, %13, %17 : vector<1x4xi1>, vector<1x4xf32>
    %c0_11 = arith.constant 0 : index
    %c0_12 = arith.constant 0 : index
    %c0_13 = arith.constant 0 : index
    %19 = vector.load %arg2[%c0_11, %c0_12, %c0_13] : memref<2x16x4xf32, #tpu.memory_space<vmem>>, vector<1x16x4xf32>
    %20 = vector.shape_cast %19 : vector<1x16x4xf32> to vector<16x4xf32>
    %21 = vector.broadcast %18 : vector<1x4xf32> to vector<16x4xf32>
    %22 = arith.mulf %20, %21 : vector<16x4xf32>
    %cst_14 = arith.constant dense<0.000000e+00> : vector<16xf32>
    %23 = vector.multi_reduction <add>, %22, %cst_14 [1] : vector<16x4xf32> to vector<16xf32>
    %24 = vector.shape_cast %23 : vector<16xf32> to vector<16x1xf32>
    %c1 = arith.constant 1 : index
    %c0_15 = arith.constant 0 : index
    %c0_16 = arith.constant 0 : index
    %25 = vector.load %arg2[%c1, %c0_15, %c0_16] : memref<2x16x4xf32, #tpu.memory_space<vmem>>, vector<1x16x4xf32>
    %26 = vector.shape_cast %25 : vector<1x16x4xf32> to vector<16x4xf32>
    %27 = vector.broadcast %18 : vector<1x4xf32> to vector<16x4xf32>
    %28 = arith.mulf %26, %27 : vector<16x4xf32>
    %cst_17 = arith.constant dense<0.000000e+00> : vector<16xf32>
    %29 = vector.multi_reduction <add>, %28, %cst_17 [1] : vector<16x4xf32> to vector<16xf32>
    %30 = vector.shape_cast %29 : vector<16xf32> to vector<16x1xf32>
    %31 = arith.maximumf %24, %30 : vector<16x1xf32>
    %32 = arith.subf %24, %31 : vector<16x1xf32>
    %33 = math.exp %32 : vector<16x1xf32>
    %34 = arith.subf %30, %31 : vector<16x1xf32>
    %35 = math.exp %34 : vector<16x1xf32>
    %36 = arith.addf %33, %35 : vector<16x1xf32>
    %cst_18 = arith.constant 1.000000e+00 : f32
    %37 = vector.broadcast %cst_18 : f32 to vector<16x1xf32>
    %38 = arith.divf %37, %36 : vector<16x1xf32>
    %c0_19 = arith.constant 0 : index
    %c0_20 = arith.constant 0 : index
    %c0_21 = arith.constant 0 : index
    %39 = vector.load %arg3[%c0_19, %c0_20, %c0_21] : memref<1x16x256xf32, #tpu.memory_space<vmem>>, vector<1x16x256xf32>
    %40 = vector.shape_cast %39 : vector<1x16x256xf32> to vector<16x256xf32>
    %41 = arith.mulf %33, %38 : vector<16x1xf32>
    %42 = vector.broadcast %41 : vector<16x1xf32> to vector<16x256xf32>
    %43 = arith.mulf %40, %42 : vector<16x256xf32>
    %c0_22 = arith.constant 0 : index
    %c0_23 = arith.constant 0 : index
    %c0_24 = arith.constant 0 : index
    %44 = vector.load %arg4[%c0_22, %c0_23, %c0_24] : memref<1x16x256xf32, #tpu.memory_space<vmem>>, vector<1x16x256xf32>
    %45 = vector.shape_cast %44 : vector<1x16x256xf32> to vector<16x256xf32>
    %46 = arith.mulf %35, %38 : vector<16x1xf32>
    %47 = vector.broadcast %46 : vector<16x1xf32> to vector<16x256xf32>
    %48 = arith.mulf %45, %47 : vector<16x256xf32>
    %49 = arith.addf %43, %48 : vector<16x256xf32>
    %c0_25 = arith.constant 0 : index
    %c0_26 = arith.constant 0 : index
    %c0_27 = arith.constant 0 : index
    %50 = vector.load %arg5[%c0_25, %c0_26, %c0_27] : memref<1x16x256xf32, #tpu.memory_space<vmem>>, vector<1x16x256xf32>
    %51 = vector.shape_cast %50 : vector<1x16x256xf32> to vector<16x256xf32>
    %52 = vector.shape_cast %49 : vector<16x256xf32> to vector<1x16x256xf32>
    tpu.vector_store %arg5[%c0_25, %c0_26, %c0_27], %52 {strides = array<i32>} : memref<1x16x256xf32, #tpu.memory_space<vmem>>, vector<1x16x256xf32>,
    return
  }
  func.func @transform_0(%arg0: i32) -> (i32, i32) {
    %c0_i32 = arith.constant 0 : i32
    %c0_i32_0 = arith.constant 0 : i32
    %c0_i32_1 = arith.constant 0 : i32
    return %c0_i32, %c0_i32_0 : i32, i32
  }
  func.func @transform_1(%arg0: i32) -> (i32, i32, i32) {
    %c0_i32 = arith.constant 0 : i32
    %c0_i32_0 = arith.constant 0 : i32
    %c0_i32_1 = arith.constant 0 : i32
    %c0_i32_2 = arith.constant 0 : i32
    return %c0_i32, %c0_i32_0, %c0_i32_1 : i32, i32, i32
  }
  func.func @transform_2(%arg0: i32) -> (i32, i32, i32) {
    %c0_i32 = arith.constant 0 : i32
    %c0_i32_0 = arith.constant 0 : i32
    %c0_i32_1 = arith.constant 0 : i32
    return %arg0, %c0_i32, %c0_i32_0 : i32, i32, i32
  }
  func.func @transform_3(%arg0: i32) -> (i32, i32, i32) {
    %c0_i32 = arith.constant 0 : i32
    %c0_i32_0 = arith.constant 0 : i32
    %c0_i32_1 = arith.constant 0 : i32
    return %arg0, %c0_i32, %c0_i32_0 : i32, i32, i32
  }
  func.func @transform_4(%arg0: i32) -> (i32, i32, i32) {
    %c0_i32 = arith.constant 0 : i32
    %c0_i32_0 = arith.constant 0 : i32
    %c0_i32_1 = arith.constant 0 : i32
    return %arg0, %c0_i32, %c0_i32_0 : i32, i32, i32
  }
}

</mosaic_0001>

<bundles_post_ra>
// kernel: tpu_custom_call.1
= control target key start
LH: loop header
LB: loop body
LE: loop exit
PB: predicated region body
PF: predicated region fallthrough
CT: control target
= control target key end

     0   :  { %9 = vsyncpa [#allocation3], 0  ;;  %s860_s0 = inlined_call_operand.vmem [shape: f32[16,4], index: 0, kind: input, shape index: {}]   ;;  %s861_s1 = inlined_call_operand.vmem [shape: f32[2,16,4], index: 1, kind: input, shape index: {}]   ;;  %s862_s2 = inlined_call_operand.hbm [shape: f32[2,16,256], index: 2, kind: input, shape index: {}]   ;;  %s863_s3 = inlined_call_operand.vmem [shape: f32[2,16,256], index: 3, kind: input, shape index: {}]   ;;  %s864_s4 = inlined_call_operand.hbm [shape: f32[2,16,256], index: 4, kind: output, shape index: {}]  }
   0x1   :  { %11 = vsyncpa [#allocation3 + $0x1], 0 }
   0x2   :  { %12 = vsyncpa [#allocation4], 0 }
   0x3   :  { %14 = vsyncpa [#allocation4 + $0x1], 0  ;;  %s641_s15 = smov 0   ;;  %s643_s16 = smov 0  }
   0x4   :  { %s645_s17 = smov 0   ;;  %s647_s18 = smov 0  }
   0x5 LB: > { %s662_s19 = sadd.s32 4294967295, %s608_s18   ;;  %s433_s20 = sadd.s32 4294967294, %s608_s18   ;;  %s608_s18 = sphi %s647_s18, %s879_s18   ;;  %s604_s17 = sphi %s645_s17, %s878_s17   ;;  %s600_s16 = sphi %s643_s16, %s877_s16   ;;  %s596_s15 = sphi %s641_s15, %s876_s15  }
   0x6   : > { %s666_s21 = sadd.s32 1, %s608_s18   ;;  %s69_s22 = sadd.s32 1, %s604_s17 }
   0x7   : > { %s66_s23 = ssub.s32 %s608_s18, %s666_s21  ;;  %p76_p0 = scmp.ne.s32.totalorder %s604_s17, %s600_s16 }
   0x8   : > { %p67_p1 = scmp.eq.s32.totalorder %s66_s23, 0  ;;  %p77_p2 = scmp.eq.s32.totalorder %s608_s18, 0 }
   0x9   : > { %p82_p3 = scmp.ne.s32.totalorder %s600_s16, %s596_s15  ;;  %p83_p4 = scmp.eq.s32.totalorder %s662_s19, 0 }
   0xa   : > { %s678_s24 = scalar_select %p67_p1, %s604_s17, %s69_s22  }
   0xb   : > { %p680_p5 = por %p77_p2, %p76_p0  ;;  %p684_p6 = por %p83_p4, %p82_p3 }
   0xc   : > { %p132_p7 = scmp.eq.s32.totalorder %s662_s19, 1  ;;  %p138_p8 = scmp.eq.s32.totalorder %s433_s20, 1 }
   0xd   : > { %s868_s26 = scalar_select %p684_p6, 1, 0 }
   0xe   : > { %p466_p10 = scmp.lt.s32.totalorder %s608_s18, 2  ;;  %p691_p11 = por %p132_p7, %p76_p0 }
   0xf   : > { %p695_p12 = por %p138_p8, %p82_p3  ;;  %s164_s29 = sand.u32 1, %s604_s17  }
  0x10   : > { %s869_s27 = scalar_select %p691_p11, 1, 0 }
  0x11   : > { %s870_s28 = scalar_select %p695_p12, 1, 0 }
  0x12   : > { %s451_s30 = sshll.u32 %s608_s18, 9  ;;  %s436_s5 = sshll.u32 %s164_s29, 5 }
  0x13   : > { %s704_s8 = scalar_lea.hbm %s862_s2, %s451_s30  ;;  %s168_s9 = scalar_lea.vmem [#allocation2], %s436_s5 }
  0x14   : > { %s175_s10 = sshll.u32 %s168_s9, 4  ;;  %p708_p13 = pnand %p466_p10, %p680_p5  ;;  %s712_s10 = int_to_ptr.vmem [resolvable:$true] %s175_s10 }
  0x15   : > { %s714_s12 = scalar_lea.sflag [#allocation3], %s164_s29  ;;  %s516_s13 = scalar_lea.hbm %s704_s8, 512 }
  0x16   : > { %p517_p0 = scmp.ne.s32.totalorder %s704_s8, %s516_s13  ;;  %p518_p1 = pneg %p708_p13 }
  0x17   : > { %s521_s22 = scalar_lea.hbm %s862_s2, 1024  ;;  %p522_p4 = scmp.lt.s32.totalorder %s704_s8, %s862_s2 }
  0x18   : > { %p519_p2 = pnand %p518_p1, %p517_p0  ;;  %p523_p5 = scmp.lt.s32.totalorder %s521_s22, %s516_s13 }
  0x1a   : > { %p520_p3 = pneg %p519_p2  ;;  %p524_p7 = por %p523_p5, %p522_p4 }
  0x1c   : > { %p525_p8 = pnand %p524_p7, %p520_p3 }
  0x1e   : > { %528 = shalt.err (!%p525_p8)
}
  0x1f   : > { %s529_s29 = scalar_lea.vmem %s712_s10, 512  ;;  %s610_s30 = smov [#allocation2]  }
  0x20   : > { %p530_p10 = scmp.ne.s32.totalorder %s712_s10, %s529_s29  ;;  %s534_s5 = sshll.u32 %s610_s30, 4  ;;  %s535_s5 = int_to_ptr.vmem [resolvable:$false] %s534_s5 }
  0x21   : > { %s536_s6 = scalar_lea.vmem %s535_s5, 1024  ;;  %p537_p2 = scmp.lt.s32.totalorder %s712_s10, %s535_s5 }
  0x22   : > { %p532_p9 = pnand %p530_p10, %p518_p1  ;;  %p538_p12 = scmp.lt.s32.totalorder %s536_s6, %s529_s29 }
  0x24   : > { %p533_p0 = pneg %p532_p9  ;;  %p539_p11 = por %p538_p12, %p537_p2 }
  0x26   : > { %p540_p6 = pnand %p539_p11, %p533_p0 }
  0x28   : > { %543 = shalt.err (!%p540_p6)
}
  0x29   : > { %s611_s7 = smov 256   ;;  %s612_s9 = smov 16  }
  0x2a   : > { %461 = dma.hbm_to_vmem [thread:$0]  (!%p708_p13), %s704_s8, 512, %s712_s10, %s714_s12, %s611_s7, %s611_s7, %s612_s9  }
  0x2b   : > { %p439_p9 = scmp.ge.s32.totalorder %s608_s18, 1  ;;  %p191_p1 = scmp.lt.s32.totalorder %s608_s18, 3 }
  0x2d   : > { %p192_p3 = pnand %p439_p9, %p191_p1 }
  0x2e   : > { %s738_s13 = sand.u32 (!%p192_p3), 1, %s600_s16   ;;  %p872_p6 = scmp.ne.s32.totalorder (!%p192_p3), %s868_s26, 0 }
  0x2f   : > { %195 = sbr.rel (%p192_p3) target bundleno = 434 (0x1b2), region = 36  ;;  %s440_s14 = sshll.u32 (!%p192_p3), %s738_s13, 5 }
  0x30   : > { %s198_s20 = scalar_lea.sflag (!%p192_p3), [#allocation3], %s738_s13  ;;  %s201_s22 = scalar_lea.vmem (!%p192_p3), [#allocation2], %s440_s14 }
  0x34   : > { %587 = dma.done.wait (%p872_p6), %s198_s20, 512  }
  0x35   : > { %589 = vsyncadd (%p872_p6), %s198_s20, 4294966784  ;;  %p231_p11 = scmp.lt.s32.totalorder %s662_s19, 1  ;;  %v753_v0 = vld [vmem:[%s201_s22] sm:$0xff]  ;;  %v755_v1 = vld [vmem:[%s201_s22 + $0x8] sm:$0xff]  ;;  %vm260_vm0 = vcmask 31744   ;;  %s230_s11 = scalar_lea.vmem [#allocation5], %s440_s14 }
  0x36   : > { %v763_v5 = vld [vmem:[%s201_s22 + $0x10] sm:$0xff]  ;;  %v765_v6 = vld [vmem:[%s201_s22 + $0x18] sm:$0xff]  ;;  %v256_v16 = vld [vmem:[%s860_s0] sm:$0xff]  ;;  %s453_s12 = sshll.u32 %s662_s19, 9  ;;  %p873_p13 = scmp.ne.s32.totalorder %s869_s27, 0 }
  0x37   : > { %s232_s8 = scalar_select %p231_p11, %s662_s19, 1  ;;  %v257_v17 = vld [vmem:[%s860_s0 + $0x8] sm:$0xff]  ;;  %v444_v32 = vld [vmem:[%s861_s1 + $0x10] sm:$0xff]  ;;  %v273_v33 = vld [vmem:[%s861_s1] sm:$0xff] }
  0x38   : > { %v274_v35 = vld [vmem:[%s861_s1 + $0x8] sm:$0xff]  ;;  %v445_v41 = vld [vmem:[%s861_s1 + $0x18] sm:$0xff]  ;;  %s815_s14 = scalar_lea.hbm %s864_s4, %s453_s12  ;;  %s335_s19 = scalar_lea.sflag [#allocation4], %s738_s13 }
  0x39   : > { %s452_s10 = sshll.u32 %s232_s8, 5  ;;  %s613_s30 = smov [#allocation5]  }
  0x3a   : > { %s235_s23 = scalar_lea.vmem %s863_s3, %s452_s10  ;;  %s548_s5 = sshll.u32 %s613_s30, 4  ;;  %s549_s5 = int_to_ptr.vmem [resolvable:$false] %s548_s5 }
  0x3b   : > { %v757_v2 = vld [vmem:[%s235_s23] sm:$0xff]  ;;  %v759_v3 = vld [vmem:[%s235_s23 + $0x8] sm:$0xff]  ;;  %v769_v8 = vld [vmem:[%s235_s23 + $0x10] sm:$0xff]  ;;  %s550_s6 = scalar_lea.vmem %s549_s5, 1024 }
  0x3c   : > { %v244_v4 = vadd.f32 %v757_v2, %v753_v0  ;;  %v245_v7 = vadd.f32 %v759_v3, %v755_v1  ;;  %v771_v9 = vld [vmem:[%s235_s23 + $0x18] sm:$0xff]  ;;  %v246_v10 = vadd.f32 %v769_v8, %v763_v5  ;;  %s348_s23 = sshll.u32 %s230_s11, 4  ;;  %s817_s23 = int_to_ptr.vmem [resolvable:$true] %s348_s23 }
  0x3d   : > { %v247_v11 = vadd.f32 %v771_v9, %v765_v6  ;;  %s544_s29 = scalar_lea.vmem %s817_s23, 512  ;;  %p551_p7 = scmp.lt.s32.totalorder %s817_s23, %s549_s5 }
  0x3e   : > { %v248_v12 = vadd.f32 %v245_v7, %v244_v4  ;;  %p545_p12 = scmp.ne.s32.totalorder %s817_s23, %s544_s29  ;;  %p552_p8 = scmp.lt.s32.totalorder %s550_s6, %s544_s29 }
  0x3f   : > { %v251_v13 = vadd.f32 %v247_v11, %v246_v10 }
  0x40   : > { %249 = vadd.xlane.f32.xlu0 %v248_v12  ;;  %p546_p4 = pnand %p545_p12, %p873_p13  ;;  %p553_p10 = por %p552_p8, %p551_p7 }
  0x42   : > { %p547_p5 = pneg %p546_p4 }
  0x44   : > { %252 = vadd.xlane.f32.xlu0 %v251_v13  ;;  %p554_p0 = pnand %p553_p10, %p547_p5 }
  0xc9   : > { %v250_v14 = vpop.xlane.xlu0 %249 }
  0xca   : > { %v254_v15 = vmul.f32 0.00390625, %v250_v14 }
  0xcc   : > { %v258_v19 = vmul.f32 %v256_v16, %v254_v15 }
  0xcd   : > { %v253_v18 = vpop.xlane.xlu0 %252 }
  0xce   : > { %v255_v20 = vmul.f32 0.00390625, %v253_v18  ;;  %v261_v22 = vsel %vm260_vm0, %v258_v19, 0.0 }
  0xd0   : > { %v259_v21 = vmul.f32 %v257_v17, %v255_v20 }
  0xd2   : > { %v262_v23 = vsel %vm260_vm0, %v259_v21, 0.0 }
  0xd3   : > { %v263_v24 = vadd.f32 %v262_v23, %v261_v22 }
  0xd5   : > { %v264_v25 = vrot.slane %v263_v24, 4 }
  0xd7   : > { %v265_v26 = vadd.f32 %v264_v25, %v263_v24 }
  0xd9   : > { %v266_v27 = vrot.slane %v265_v26, 2 }
  0xdb   : > { %v267_v28 = vadd.f32 %v266_v27, %v265_v26 }
  0xdd   : > { %v268_v29 = vrot.slane %v267_v28, 1 }
  0xdf   : > { %v269_v30 = vadd.f32 %v268_v29, %v267_v28 }
  0xe1   : > { %vm270_vm1 = vcmp.ge.f32.partialorder %v269_v30, 0.0  ;;  %v271_v31 = vmul.f32 0.2, %v269_v30 }
  0xe3   : > { %v272_v34 = vsel %vm270_vm1, %v269_v30, %v271_v31 }
  0xe4   : > { %v286_v36 = vmul.f32 %v444_v32, %v272_v34  ;;  %v275_v37 = vmul.f32 %v273_v33, %v272_v34  ;;  %v276_v40 = vmul.f32 %v274_v35, %v272_v34  ;;  %v287_v43 = vmul.f32 %v445_v41, %v272_v34 }
  0xe6   : > { %v288_v38 = vsel %vm260_vm0, %v286_v36, 0.0  ;;  %v277_v39 = vsel %vm260_vm0, %v275_v37, 0.0  ;;  %v280_v42 = vsel %vm260_vm0, %v276_v40, 0.0  ;;  %v291_v44 = vsel %vm260_vm0, %v287_v43, 0.0 }
  0xe7   : > { %289 = vadd.xlane.f32.xlu0 %v288_v38  ;;  %278 = vadd.xlane.f32.xlu1 %v277_v39 }
  0xeb   : > { %281 = vadd.xlane.f32.xlu1 %v280_v42 }
  0xef   : > { %292 = vadd.xlane.f32.xlu1 %v291_v44 }
 0x170   : > { %v290_v45 = vpop.xlane.xlu0 %289  ;;  %v279_v46 = vpop.xlane.xlu1 %278 }
 0x171   : > { %v294_v47 = vmax.f32 %v279_v46, %v290_v45 }
 0x173   : > { %v296_v48 = vsub.f32 %v279_v46, %v294_v47  ;;  %v302_v49 = vsub.f32 %v290_v45, %v294_v47 }
 0x174   : > { %v282_v50 = vpop.xlane.xlu1 %281 }
 0x175   : > { %v298_v51 = vmul.f32 1.442695, %v296_v48  ;;  %v304_v52 = vmul.f32 1.442695, %v302_v49 }
 0x177   : > { %504 = vpow2.f32 %v298_v51 }
 0x178   : > { %506 = vpow2.f32 %v304_v52  ;;  %v293_v53 = vpop.xlane.xlu1 %292 }
 0x179   : > { %v295_v54 = vmax.f32 %v282_v50, %v293_v53 }
 0x17b   : > { %v297_v55 = vsub.f32 %v282_v50, %v295_v54  ;;  %v303_v56 = vsub.f32 %v293_v53, %v295_v54 }
 0x17d   : > { %v300_v57 = vmul.f32 1.442695, %v297_v55  ;;  %v306_v58 = vmul.f32 1.442695, %v303_v56 }
 0x17f   : > { %508 = vpow2.f32 %v300_v57 }
 0x180   : > { %510 = vpow2.f32 %v306_v58 }
 0x184   : > { %v505_v59 = vpop.eup %504 }
 0x185   : > { %v507_v60 = vpop.eup %506 }
 0x186   : > { %v308_v61 = vadd.f32 %v507_v60, %v505_v59 }
 0x188   : > { %512 = vrcp.f32 %v308_v61 }
 0x18c   : > { %v509_v62 = vpop.eup %508 }
 0x18d   : > { %v511_v63 = vpop.eup %510 }
 0x18e   : > { %v309_v4 = vadd.f32 %v511_v63, %v509_v62 }
 0x190   : > { %514 = vrcp.f32 %v309_v4 }
 0x195   : > { %v513_v7 = vpop.eup %512 }
 0x196   : > { %v314_v10 = vmul.f32 %v513_v7, %v505_v59  ;;  %v320_v11 = vmul.f32 %v513_v7, %v507_v60 }
 0x198   : > { %v316_v12 = vmul.f32 %v314_v10, %v753_v0  ;;  %v317_v13 = vmul.f32 %v314_v10, %v755_v1  ;;  %v322_v14 = vmul.f32 %v320_v11, %v757_v2  ;;  %v323_v15 = vmul.f32 %v320_v11, %v759_v3 }
 0x19a   : > { %v326_v16 = vadd.f32 %v322_v14, %v316_v12  ;;  %v327_v17 = vadd.f32 %v323_v15, %v317_v13 }
 0x19c   : > { %330 = vst [vmem:[%s230_s11] sm:$0xff] %v326_v16  ;;  %331 = vst [vmem:[%s230_s11 + $0x8] sm:$0xff] %v327_v17 }
 0x19d   : > { %v515_v18 = vpop.eup %514 }
 0x19e   : > { %v315_v19 = vmul.f32 %v515_v18, %v509_v62  ;;  %v321_v20 = vmul.f32 %v515_v18, %v511_v63 }
 0x1a0   : > { %v318_v0 = vmul.f32 %v315_v19, %v763_v5  ;;  %v319_v1 = vmul.f32 %v315_v19, %v765_v6  ;;  %v324_v2 = vmul.f32 %v321_v20, %v769_v8  ;;  %v325_v3 = vmul.f32 %v321_v20, %v771_v9 }
 0x1a2   : > { %v328_v21 = vadd.f32 %v324_v2, %v318_v0  ;;  %v329_v22 = vadd.f32 %v325_v3, %v319_v1 }
 0x1a4   : > { %332 = vst [vmem:[%s230_s11 + $0x10] sm:$0xff] %v328_v21  ;;  %333 = vst [vmem:[%s230_s11 + $0x18] sm:$0xff] %v329_v22 }
 0x1a5   : > { %557 = shalt.err (!%p554_p0)
}
 0x1a6   : > { %s558_s7 = scalar_lea.hbm %s815_s14, 512  ;;  %s562_s22 = scalar_lea.hbm %s864_s4, 1024 }
 0x1a7   : > { %p559_p2 = scmp.ne.s32.totalorder %s815_s14, %s558_s7  ;;  %p563_p3 = scmp.lt.s32.totalorder %s815_s14, %s864_s4 }
 0x1a8   : > { %p564_p6 = scmp.lt.s32.totalorder %s562_s22, %s558_s7 }
 0x1a9   : > { %p560_p9 = pnand %p559_p2, %p873_p13 }
 0x1aa   : > { %p565_p11 = por %p564_p6, %p563_p3 }
 0x1ab   : > { %p561_p1 = pneg %p560_p9 }
 0x1ad   : > { %p566_p12 = pnand %p565_p11, %p561_p1 }
 0x1af   : > { %569 = shalt.err (!%p566_p12)
}
 0x1b0   : > { %s614_s11 = smov 256   ;;  %s615_s12 = smov 16  }
 0x1b1   : > { %456 = dma.vmem_to_hbm [thread:$0]  (%p873_p13), %s817_s23, 512, %s815_s14, %s335_s19, %s614_s11, %s614_s11, %s615_s12  }
 0x1b2 PF: > { %s363_s26 = sand.u32 1, %s596_s15   ;;  %p874_p4 = scmp.ne.s32.totalorder %s870_s28, 0 }
 0x1b3   : > { %p875_p5 = scmp.ge.s32.totalorder %s608_s18, 2  ;;  %s364_s25 = scalar_lea.sflag [#allocation4], %s363_s26 }
 0x1b5   : > { %p463_p7 = pnand %p875_p5, %p874_p4 }
 0x1b7   : > { %p464_p8 = pneg %p463_p7 }
 0x1b9   : > { %591 = dma.done.wait (%p464_p8), %s364_s25, 512  }
 0x1ba   : > { %593 = vsyncadd (%p464_p8), %s364_s25, 4294966784  ;;  %p17_p10 = scmp.ge.s32.totalorder %s666_s21, 4   ;;  %s876_s15 = smov %s600_s16 }
 0x1bb   : > { %s877_s16 = smov %s604_s17  ;;  %s878_s17 = smov %s678_s24 }
 0x1bc   : > { %s879_s18 = smov %s666_s21  ;;  %19 = sbr.rel (!%p17_p10) target bundleno = 5 (0x5), region = 85 }
 0x1c1   :  { %369 = vsyncpa [#allocation3], 1 }
 0x1c2   :  { %371 = vsyncpa [#allocation3 + $0x1], 1 }
 0x1c3   :  { %372 = vsyncpa [#allocation4], 1 }
 0x1c4   :  { %374 = vsyncpa [#allocation4 + $0x1], 1 }

</bundles_post_ra>
